<compile_context>
chip_gen: v6e
topology: v6e:2x2x1
jax: 0.10.0
libtpu: 0.0.40
codegen_flags: <defaults>
</compile_context>

<pallas_src>
import numpy as np
import jax
import jax.numpy as jnp
from jax import lax
from jax.experimental import pallas as pl
from jax.experimental.pallas import tpu as pltpu


# ------------------------------- helpers -----------------------------------

_TL_CAP = 16 * 1024           # absolute lane-tile cap (multiple of 128)
_TILE_VMEM_BUDGET = 12 << 20  # v7x-safe budget used for tile sizing only


def _round_up(x, m):
    return ((x + m - 1) // m) * m


def _vmem_limit_bytes():
    """64 MiB on 128-MiB-VMEM parts (v5e/v6e), 32 MiB on 64-MiB v7x."""
    try:
        cap = int(pltpu.get_tpu_info().vmem_capacity_bytes)
    except Exception:  # off-device tracing / API drift -> conservative default
        cap = 64 * 1024 * 1024
    return int(min(cap // 2, 64 * 1024 * 1024))


def _pick_lane_tile(L, C, stream_bytes_per_elem):
    """C-aware lane tile: fit double-buffered streams in a v7x-safe budget.

    stream_bytes_per_elem: summed bytes/element of all HBM streams that carry
    a full (C, tl) block.  C < 8 still occupies 8 sublanes in VMEM.
    """
    c_pad = max(_round_up(C, 8), 8)
    per_lane = 2 * c_pad * stream_bytes_per_elem      # x2: double buffering
    tl = (_TILE_VMEM_BUDGET // max(per_lane, 1)) // 128 * 128
    tl = max(512, tl)
    tl = min(tl, _TL_CAP, _round_up(L, 128))
    return int(tl)


# ---------------------------- Pallas kernels --------------------------------

@jax.jit
def softmax_and_mask(pred):
    """Channel softmax of NCHW logits, flattened to (B, C, H*W), plus an int8
    (softmax > 0.5) mask (the only thing shipped to the host for seg_dtm)."""
    B, C, H, W = pred.shape
    L = H * W
    x = pred.reshape(B, C, L).astype(jnp.float32)

    tl = _pick_lane_tile(L, C, 4 + 4 + 1)   # f32 in + f32 out + i8 mask out
    nl = pl.cdiv(L, tl)

    def kernel(x_ref, soft_ref, mask_ref):
        v = x_ref[...]                       # (1, C, tl)
        if C <= 8:
            # Channel count fits one sublane tile: unrolled max/sum avoids
            # XLU sublane-reduce traffic (free; kernel is HBM-bound).
            m = v[:, 0:1, :]
            for c in range(1, C):
                m = jnp.maximum(m, v[:, c:c + 1, :])
            e = jnp.exp(v - m)
            s = e[:, 0:1, :]
            for c in range(1, C):
                s = s + e[:, c:c + 1, :]
        else:
            m = jnp.max(v, axis=1, keepdims=True)
            e = jnp.exp(v - m)
            s = jnp.sum(e, axis=1, keepdims=True)
        # Exact reciprocal: exp dominates EUP work anyway, and the exact value
        # feeds the >0.5 threshold used for seg_dtm on the host.
        y = e * pl.reciprocal(s)
        soft_ref[...] = y
        mask_ref[...] = (y > 0.5).astype(jnp.int8)

    cost = pl.CostEstimate(
        flops=4 * B * C * L,
        transcendentals=B * C * L,
        bytes_accessed=B * C * L * (4 + 4 + 1),
    )
    soft, mask = pl.pallas_call(
        kernel,
        out_shape=(jax.ShapeDtypeStruct((B, C, L), jnp.float32),
                   jax.ShapeDtypeStruct((B, C, L), jnp.int8)),
        grid=(B, nl),
        in_specs=[pl.BlockSpec((1, C, tl), lambda b, l: (b, 0, l))],
        out_specs=[pl.BlockSpec((1, C, tl), lambda b, l: (b, 0, l)),
                   pl.BlockSpec((1, C, tl), lambda b, l: (b, 0, l))],
        compiler_params=pltpu.CompilerParams(
            dimension_semantics=("parallel", "parallel"),
            vmem_limit_bytes=_vmem_limit_bytes(),
        ),
        cost_estimate=cost,
    )(x)
    return soft, mask


@jax.jit
def hd_loss_pallas(seg_soft_flat, target, dtm2_flat):
    """hd_loss hot path: mean of (seg - onehot)^2 * (seg_dtm^2 + gt_dtm^2).

    seg_soft_flat: (B, C, L) f32 softmax, dtm2_flat: (B, C, L) f32 pre-combined
    seg_dtm^2 + gt_dtm^2, target: (B, H, W) integer labels.
    """
    B, C, L = seg_soft_flat.shape

    tl = _pick_lane_tile(L, C, 4 + 4)       # seg f32 + dtm2 f32 (label ~free)
    nl = pl.cdiv(L, tl)
    # Batch-independent megacore split (v7x): outer "parallel" lane chunk,
    # inner "arbitrary" accumulation axis.
    # TODO(synk): odd tile counts fall back to a single outer chunk to keep
    # every block index in-bounds without clamping inside the index_map.
    n_outer = 2 if (nl >= 2 and nl % 2 == 0) else 1
    n_inner = nl // n_outer

    seg = seg_soft_flat.astype(jnp.float32)
    d2 = dtm2_flat.astype(jnp.float32)
    lbl_dt = jnp.int8 if C <= 127 else jnp.int32   # 4x smaller label stream
    lbl = jnp.clip(target.astype(jnp.int32), 0, C - 1).astype(lbl_dt)
    lbl = lbl.reshape(B, 1, L)

    def kernel(seg_ref, lbl_ref, dtm2_ref, o_ref, lane_acc):
        i = pl.program_id(2)

        @pl.when(i == 0)
        def _init():
            lane_acc[...] = jnp.zeros_like(lane_acc)

        seg_v = seg_ref[...]                                  # (1, C, tl)
        # One-hot target rebuilt in-kernel from int labels (saves a full f32
        # (B,C,L) HBM stream vs. materializing one_hot outside).
        ch = lax.broadcasted_iota(jnp.int32, seg_v.shape, 1)
        one_hot = (ch == lbl_ref[...].astype(jnp.int32)).astype(jnp.float32)
        delta = seg_v - one_hot
        prod = delta * delta * dtm2_ref[...]                  # (1, C, tl)

        # Channel (sublane) reduce only; the cross-lane (XLU) reduce happens
        # exactly once, in the epilogue.
        if C <= 8:
            lane_sum = prod[:, 0:1, :]
            for c in range(1, C):
                lane_sum = lane_sum + prod[:, c:c + 1, :]
        else:
            lane_sum = jnp.sum(prod, axis=1, keepdims=True)   # (1, 1, tl)

        # Mask lanes past L (handles the partial edge tile; no jnp.pad).
        g = pl.program_id(1) * n_inner + i                    # global tile idx
        lane = lax.broadcasted_iota(jnp.int32, (1, 1, tl), 2)
        valid = (g * tl + lane) < L
        lane_acc[...] = lane_acc[...] + jnp.where(valid, lane_sum, 0.0)

        @pl.when(i == n_inner - 1)
        def _flush():
            # Single cross-lane reduction per (b, outer) chunk; broadcast the
            # scalar across the lane-dense (1, 128) output block.
            o_ref[...] = jnp.zeros_like(o_ref) + jnp.sum(lane_acc[...])

    cost = pl.CostEstimate(
        flops=6 * B * C * L,
        transcendentals=0,
        bytes_accessed=2 * B * C * L * 4 + B * L + B * n_outer * 128 * 4,
    )
    out = pl.pallas_call(
        kernel,
        out_shape=jax.ShapeDtypeStruct((1, B * n_outer * 128), jnp.float32),
        grid=(B, n_outer, n_inner),
        in_specs=[
            pl.BlockSpec((1, C, tl), lambda b, o, i: (b, 0, o * n_inner + i)),
            pl.BlockSpec((1, 1, tl), lambda b, o, i: (b, 0, o * n_inner + i)),
            pl.BlockSpec((1, C, tl), lambda b, o, i: (b, 0, o * n_inner + i)),
        ],
        # Per-(batch, outer-chunk) partial sums; block index is constant along
        # the innermost "arbitrary" axis, so the block stays resident in VMEM.
        out_specs=pl.BlockSpec((1, 128), lambda b, o, i: (0, b * n_outer + o)),
        scratch_shapes=[pltpu.VMEM((1, 1, tl), jnp.float32)],
        compiler_params=pltpu.CompilerParams(
            dimension_semantics=("parallel", "parallel", "arbitrary"),
            vmem_limit_bytes=_vmem_limit_bytes(),
        ),
        cost_estimate=cost,
    )(seg, lbl, d2)

    per_chunk = out.reshape(B * n_outer, 128)[:, 0]
    # mean -> sum * (1/N) with a trace-time constant (true element count).
    return jnp.sum(per_chunk) * (1.0 / float(B * C * L))


# ----------------------- host-side DTM (no_grad path) -----------------------

_EDT_INF = 1e20


def _dt1d_sq(f):
    """1-D squared distance transform (Felzenszwalb & Huttenlocher)."""
    n = f.shape[0]
    d = np.empty(n, dtype=np.float64)
    v = np.zeros(n, dtype=np.int64)
    z = np.empty(n + 1, dtype=np.float64)
    k = 0
    z[0] = -_EDT_INF
    z[1] = _EDT_INF
    for q in range(1, n):
        s = ((f[q] + q * q) - (f[v[k]] + v[k] * v[k])) / (2.0 * q - 2.0 * v[k])
        while s <= z[k]:
            k -= 1
            s = ((f[q] + q * q) - (f[v[k]] + v[k] * v[k])) / (2.0 * q - 2.0 * v[k])
        k += 1
        v[k] = q
        z[k] = s
        z[k + 1] = _EDT_INF
    k = 0
    for q in range(n):
        while z[k + 1] < q:
            k += 1
        d[q] = (q - v[k]) ** 2 + f[v[k]]
    return d


def _edt_numpy(posmask):
    """Exact Euclidean distance-to-nearest-background (separable two-pass EDT).

    Equivalent to scipy.ndimage.distance_transform_edt for a 2-D boolean mask.
    """
    H, W = posmask.shape
    if not (~posmask).any():
        # TODO(synk): scipy edge case when there is no background pixel; unreachable here.
        return np.zeros((H, W), dtype=np.float64)
    f = np.where(posmask, _EDT_INF, 0.0).astype(np.float64)
    for x in range(W):          # pass 1: columns
        f[:, x] = _dt1d_sq(f[:, x])
    for y in range(H):          # pass 2: rows
        f[y, :] = _dt1d_sq(f[y, :])
    return np.sqrt(f)


def compute_dtm_np(img_gt, out_shape):
    """Numpy port of the reference compute_dtm (channel 0 is skipped)."""
    fg_dtm = np.zeros(out_shape, dtype=np.float64)
    for b in range(out_shape[0]):
        for c in range(1, out_shape[1]):
            posmask = np.asarray(img_gt[b][c]).astype(bool)
            if posmask.any():
                fg_dtm[b][c] = _edt_numpy(posmask)
    return fg_dtm


# ------------------------------ module forward ------------------------------

def hausdorff_loss_forward(pred, target):
    """HausdorffLoss.forward (class_weight=None, loss_weight=1.0, no params)."""
    B, C, H, W = pred.shape

    # pred_soft = F.softmax(pred, dim=1) (+ int8 >0.5 mask)  -> Pallas kernel
    pred_soft_flat, seg_mask_flat = softmax_and_mask(pred)

    # torch.no_grad(): distance-transform maps on host (numpy), as in the
    # reference.  Only the 1-byte threshold mask and the labels cross PCIe;
    # the f32 softmax stays on device for the hd_loss kernel.
    seg_mask_np = np.asarray(jax.device_get(seg_mask_flat)).reshape(B, C, H, W).astype(bool)
    tgt_np = np.clip(np.asarray(jax.device_get(target)).astype(np.int64), 0, C - 1)
    one_hot_np = tgt_np[:, None, :, :] == np.arange(C)[None, :, None, None]
    gt_dtm = compute_dtm_np(one_hot_np, (B, C, H, W))
    seg_dtm = compute_dtm_np(seg_mask_np, (B, C, H, W))
    # Pre-combine the two maps into a single f32 stream for the hot kernel.
    dtm2 = (seg_dtm ** 2 + gt_dtm ** 2).astype(np.float32).reshape(B, C, H * W)

    # total_hd_loss = hd_loss(pred_soft, one_hot_target, seg_dtm, gt_dtm)
    return hd_loss_pallas(pred_soft_flat, target, jnp.asarray(dtm2))


# ----------------------------------- main -----------------------------------

if __name__ == "__main__":
    key = jax.random.PRNGKey(0)
    kp, kt = jax.random.split(key)
    B, C, H, W = 2, 4, 16, 16
    pred = jax.random.normal(kp, (B, C, H, W), dtype=jnp.float32)
    target = jax.random.randint(kt, (B, H, W), 0, C, dtype=jnp.int32)

    loss = hausdorff_loss_forward(pred, target)
    loss = jax.block_until_ready(loss)

    # --------- pure numpy (float64) reference check ---------
    pred_np = np.asarray(pred, dtype=np.float64)
    x = pred_np - pred_np.max(axis=1, keepdims=True)
    soft_ref = np.exp(x)
    soft_ref = soft_ref / soft_ref.sum(axis=1, keepdims=True)
    tgt_ref = np.clip(np.asarray(target), 0, C - 1)
    oh_ref = np.eye(C)[tgt_ref].transpose(0, 3, 1, 2)
    gt_dtm_ref = compute_dtm_np(oh_ref, soft_ref.shape)
    seg_dtm_ref = compute_dtm_np(soft_ref > 0.5, soft_ref.shape)
    ref = np.mean((soft_ref - oh_ref) ** 2 * (seg_dtm_ref ** 2 + gt_dtm_ref ** 2))

    assert np.allclose(float(loss), ref, rtol=1e-4, atol=1e-3), (float(loss), ref)
    print("KERNEL_OK")
</pallas_src>

<mosaic_0001>
module attributes {stable_mosaic.version = 11 : i64} {
  func.func @kernel(%arg0: i32, %arg1: i32, %arg2: memref<1x4x256xf32, #tpu.memory_space<vmem>>, %arg3: memref<1x4x256xf32, #tpu.memory_space<vmem>>, %arg4: memref<1x4x256xi8, #tpu.memory_space<vmem>>) attributes {dimension_semantics = [#tpu.dimension_semantics<parallel>, #tpu.dimension_semantics<parallel>], iteration_bounds = array<i64: 2, 1>, scalar_prefetch = 0 : i64, scratch_operands = 0 : i64, tpu.core_type = #tpu.core_type<tc>, window_params = [{transform_indices = @transform_0, window_bounds = array<i64: 1, 4, 256>}, {transform_indices = @transform_1, window_bounds = array<i64: 1, 4, 256>}, {transform_indices = @transform_2, window_bounds = array<i64: 1, 4, 256>}]} {
    %c0 = arith.constant 0 : index
    %c0_0 = arith.constant 0 : index
    %c0_1 = arith.constant 0 : index
    %0 = vector.load %arg2[%c0, %c0_0, %c0_1] : memref<1x4x256xf32, #tpu.memory_space<vmem>>, vector<1x4x256xf32>
    %1 = vector.extract_strided_slice %0 {offsets = [0, 0, 0], sizes = [1, 1, 256], strides = [1, 1, 1]} : vector<1x4x256xf32> to vector<1x1x256xf32>
    %2 = vector.extract_strided_slice %0 {offsets = [0, 1, 0], sizes = [1, 1, 256], strides = [1, 1, 1]} : vector<1x4x256xf32> to vector<1x1x256xf32>
    %3 = arith.maximumf %1, %2 : vector<1x1x256xf32>
    %4 = vector.extract_strided_slice %0 {offsets = [0, 2, 0], sizes = [1, 1, 256], strides = [1, 1, 1]} : vector<1x4x256xf32> to vector<1x1x256xf32>
    %5 = arith.maximumf %3, %4 : vector<1x1x256xf32>
    %6 = vector.extract_strided_slice %0 {offsets = [0, 3, 0], sizes = [1, 1, 256], strides = [1, 1, 1]} : vector<1x4x256xf32> to vector<1x1x256xf32>
    %7 = arith.maximumf %5, %6 : vector<1x1x256xf32>
    %8 = vector.broadcast %7 : vector<1x1x256xf32> to vector<1x4x256xf32>
    %9 = arith.subf %0, %8 : vector<1x4x256xf32>
    %10 = math.exp %9 : vector<1x4x256xf32>
    %11 = vector.extract_strided_slice %10 {offsets = [0, 0, 0], sizes = [1, 1, 256], strides = [1, 1, 1]} : vector<1x4x256xf32> to vector<1x1x256xf32>
    %12 = vector.extract_strided_slice %10 {offsets = [0, 1, 0], sizes = [1, 1, 256], strides = [1, 1, 1]} : vector<1x4x256xf32> to vector<1x1x256xf32>
    %13 = arith.addf %11, %12 : vector<1x1x256xf32>
    %14 = vector.extract_strided_slice %10 {offsets = [0, 2, 0], sizes = [1, 1, 256], strides = [1, 1, 1]} : vector<1x4x256xf32> to vector<1x1x256xf32>
    %15 = arith.addf %13, %14 : vector<1x1x256xf32>
    %16 = vector.extract_strided_slice %10 {offsets = [0, 3, 0], sizes = [1, 1, 256], strides = [1, 1, 1]} : vector<1x4x256xf32> to vector<1x1x256xf32>
    %17 = arith.addf %15, %16 : vector<1x1x256xf32>
    %18 = tpu.reciprocal %17 : vector<1x1x256xf32> -> vector<1x1x256xf32>
    %19 = vector.broadcast %18 : vector<1x1x256xf32> to vector<1x4x256xf32>
    %20 = arith.mulf %10, %19 : vector<1x4x256xf32>
    %c0_2 = arith.constant 0 : index
    %c0_3 = arith.constant 0 : index
    %c0_4 = arith.constant 0 : index
    %21 = vector.load %arg3[%c0_2, %c0_3, %c0_4] : memref<1x4x256xf32, #tpu.memory_space<vmem>>, vector<1x4x256xf32>
    tpu.vector_store %arg3[%c0_2, %c0_3, %c0_4], %20 {strides = array<i32>} : memref<1x4x256xf32, #tpu.memory_space<vmem>>, vector<1x4x256xf32>,
    %cst = arith.constant 5.000000e-01 : f32
    %22 = vector.broadcast %cst : f32 to vector<1x4x256xf32>
    %23 = arith.cmpf ogt, %20, %22 : vector<1x4x256xf32>
    %24 = arith.extui %23 : vector<1x4x256xi1> to vector<1x4x256xi8>
    %c0_5 = arith.constant 0 : index
    %c0_6 = arith.constant 0 : index
    %c0_7 = arith.constant 0 : index
    %25 = vector.load %arg4[%c0_5, %c0_6, %c0_7] : memref<1x4x256xi8, #tpu.memory_space<vmem>>, vector<1x4x256xi8>
    tpu.vector_store %arg4[%c0_5, %c0_6, %c0_7], %24 {strides = array<i32>} : memref<1x4x256xi8, #tpu.memory_space<vmem>>, vector<1x4x256xi8>,
    return
  }
  func.func @transform_0(%arg0: i32, %arg1: i32) -> (i32, i32, i32) {
    %c0_i32 = arith.constant 0 : i32
    %c0_i32_0 = arith.constant 0 : i32
    return %arg0, %c0_i32, %arg1 : i32, i32, i32
  }
  func.func @transform_1(%arg0: i32, %arg1: i32) -> (i32, i32, i32) {
    %c0_i32 = arith.constant 0 : i32
    %c0_i32_0 = arith.constant 0 : i32
    return %arg0, %c0_i32, %arg1 : i32, i32, i32
  }
  func.func @transform_2(%arg0: i32, %arg1: i32) -> (i32, i32, i32) {
    %c0_i32 = arith.constant 0 : i32
    %c0_i32_0 = arith.constant 0 : i32
    return %arg0, %c0_i32, %arg1 : i32, i32, i32
  }
}

</mosaic_0001>

<bundles_post_ra>
// kernel: softmax_and_mask.1
= control target key start
LH: loop header
LB: loop body
LE: loop exit
PB: predicated region body
PF: predicated region fallthrough
CT: control target
= control target key end

     0   :  { %8 = vsyncpa [#allocation3], 0  ;;  %s829_s0 = inlined_call_operand.vmem [shape: f32[2,4,256], index: 0, kind: input, shape index: {}]   ;;  %s830_s1 = inlined_call_operand.hbm [shape: f32[2,4,256], index: 1, kind: output, shape index: {0}]   ;;  %s831_s2 = inlined_call_operand.hbm [shape: s8[2,4,256], index: 2, kind: output, shape index: {1}]  }
   0x1   :  { %10 = vsyncpa [#allocation3 + $0x1], 0 }
   0x2   :  { %11 = vsyncpa [#allocation5], 0 }
   0x3   :  { %13 = vsyncpa [#allocation5 + $0x1], 0  ;;  %s685_s9 = smov 0   ;;  %s687_s10 = smov 0  }
   0x4   :  { %s689_s11 = smov 0   ;;  %s691_s12 = smov 0  }
   0x5   :  { %s693_s13 = smov 0   ;;  %s695_s14 = smov 0  }
   0x6 LB: > { %s465_s15 = sadd.s32 4294967295, %s664_s14   ;;  %s466_s16 = sadd.s32 4294967294, %s664_s14   ;;  %s664_s14 = sphi %s695_s14, %s19_s14   ;;  %s660_s13 = sphi %s693_s13, %s838_s13   ;;  %s656_s12 = sphi %s691_s12, %s837_s12   ;;  %s652_s11 = sphi %s689_s11, %s836_s11   ;;  %s648_s10 = sphi %s687_s10, %s835_s10   ;;  %s644_s9 = sphi %s685_s9, %s834_s9  }
   0x7   : > { %s31_s17 = sadd.s32 1, %s660_s13  ;;  %s68_s18 = sadd.s32 1, %s652_s11 }
   0x8   : > { %p33_p0 = scmp.ge.s32.totalorder %s31_s17, 2  ;;  %p78_p1 = scmp.ne.s32.totalorder %s652_s11, %s648_s10 }
   0x9   : > { %p79_p2 = scmp.eq.s32.totalorder %s465_s15, 1  ;;  %p84_p3 = scmp.ne.s32.totalorder %s648_s10, %s644_s9 }
   0xa   : > { %s840_s17 = smov (%p33_p0, %s31_s17), 0  ;;  %p85_p5 = scmp.eq.s32.totalorder %s466_s16, 1 }
   0xb   : > { %p725_p4 = por %p79_p2, %p78_p1  ;;  %s63_s20 = ssub.s32 %s660_s13, %s840_s17 }
   0xc   : > { %p469_p6 = scmp.ge.s32.totalorder %s664_s14, 1  ;;  %p66_p7 = scmp.eq.s32.totalorder %s63_s20, 0 }
   0xd   : > { %p732_p8 = por %p85_p5, %p84_p3  ;;  %p144_p9 = scmp.lt.s32.totalorder %s664_s14, 3 }
   0xe   : > { %s738_s22 = scalar_select %p66_p7, %s652_s11, %s68_s18  }
   0xf   : > { %p145_p10 = pnand %p469_p6, %p144_p9 }
  0x10   : > { %p176_p11 = scmp.lt.s32.totalorder (!%p145_p10), %s656_s12, 1  ;;  %s750_s28 = sand.u32 (!%p145_p10), 1, %s648_s10  }
  0x11   : > { %148 = sbr.rel (%p145_p10) target bundleno = 133 (0x85), region = 24  ;;  %s470_s29 = sshll.u32 (!%p145_p10), %s750_s28, 3 }
  0x12   : > { %s167_s30 = scalar_lea.vmem (!%p145_p10), [#allocation2], %s470_s29  ;;  %s490_s4 = sshll.u32 (!%p145_p10), %s656_s12, 7 }
  0x13   : > { %s338_s3 = sshll.u32 (!%p145_p10), %s167_s30, 4  ;;  %s759_s7 = scalar_lea.hbm (!%p145_p10), %s830_s1, %s490_s4  ;;  %s754_s3 = int_to_ptr.vmem [resolvable:$true] %s338_s3 }
  0x14   : > { %s317_s8 = scalar_lea.sflag (!%p145_p10), [#allocation3], %s750_s28  ;;  %s558_s15 = scalar_lea.vmem (!%p145_p10), %s754_s3, 128 }
  0x15   : > { %p559_p12 = scmp.ne.s32.totalorder (!%p145_p10), %s754_s3, %s558_s15  ;;  %s668_s16 = smov (!%p145_p10), [#allocation2]  }
  0x16   : > { %s177_s23 = scalar_select %p176_p11, %s656_s12, 1  ;;  %v204_v0 = vlaneseq  ;;  %v666_v31 = vmov 1966171168   ;;  %v667_v35 = vmov 0  }
  0x17   : > { %v275_v32 = vunpack.c.l.s4 %v666_v31  ;;  %p560_p13 = pnand %p559_p12, %p725_p4  ;;  %s562_s18 = sshll.u32 %s668_s16, 4  ;;  %s563_s18 = int_to_ptr.vmem [resolvable:$false] %s562_s18 }
  0x18   : > { %s489_s24 = sshll.u32 %s177_s23, 3  ;;  %v745_v4 = vshrl.u32 %v204_v0, 7  ;;  %s564_s20 = scalar_lea.vmem %s563_s18, 256 }
  0x19   : > { %s183_s27 = scalar_lea.vmem %s829_s0, %s489_s24  ;;  %v276_v34 = vunpack.c.0.s8 %v275_v32  ;;  %p561_p0 = pneg %p560_p13 }
  0x1a   : > { %v189_v1 = vld [vmem:[%s183_s27] sm:$0xff]  ;;  %v206_v8 = vsub.s32 0, %v745_v4  ;;  %v210_v9 = vsub.s32 4, %v745_v4  ;;  %p565_p1 = scmp.lt.s32.totalorder %s754_s3, %s563_s18  ;;  %p566_p2 = scmp.lt.s32.totalorder %s564_s20, %s558_s15 }
  0x1b   : > { %v474_v2 = vrot.slane %v189_v1, 9  ;;  %v475_v3 = vrot.slane %v189_v1, 10  ;;  %v476_v6 = vrot.slane %v189_v1, 11 }
  0x1c   : > { %p567_p3 = por %p566_p2, %p565_p1 }
  0x1d   : > { %v194_v5 = vmax.f32 %v189_v1, %v474_v2 }
  0x1e   : > { %p568_p5 = pnand %p567_p3, %p561_p0 }
  0x1f   : > { %v198_v7 = vmax.f32 %v194_v5, %v475_v3 }
  0x21   : > { %v202_v10 = vmax.f32 %v198_v7, %v476_v6 }
  0x23   : > { %v207_v11 = vrot.slane %v202_v10, %v206_v8  ;;  %v211_v12 = vrot.slane %v202_v10, %v210_v9 }
  0x25   : > { %v217_v13 = vrot.slane %v207_v11, %v206_v8  ;;  %v221_v14 = vrot.slane %v211_v12, %v206_v8 }
  0x27   : > { %v224_v15 = vcombine.low %v217_v13, %v221_v14 }
  0x29   : > { %v226_v16 = vsub.f32 %v189_v1, %v224_v15 }
  0x2b   : > { %v227_v17 = vmul.f32 1.442695, %v226_v16 }
  0x2d   : > { %554 = vpow2.f32 %v227_v17 }
  0x3a   : > { %v555_v18 = vpop.eup %554 }
  0x3b   : > { %v477_v19 = vrot.slane %v555_v18, 9  ;;  %v478_v20 = vrot.slane %v555_v18, 10  ;;  %v479_v22 = vrot.slane %v555_v18, 11 }
  0x3d   : > { %v233_v21 = vadd.f32 %v555_v18, %v477_v19 }
  0x3f   : > { %v237_v23 = vadd.f32 %v478_v20, %v233_v21 }
  0x41   : > { %v241_v24 = vadd.f32 %v479_v22, %v237_v23 }
  0x43   : > { %556 = vrcp.f32 %v241_v24 }
  0x50   : > { %v557_v25 = vpop.eup %556 }
  0x51   : > { %v247_v26 = vrot.slane %v557_v25, %v206_v8  ;;  %v251_v27 = vrot.slane %v557_v25, %v210_v9 }
  0x53   : > { %v257_v28 = vrot.slane %v247_v26, %v206_v8  ;;  %v261_v29 = vrot.slane %v251_v27, %v206_v8 }
  0x55   : > { %v264_v30 = vcombine.low %v257_v28, %v261_v29 }
  0x57   : > { %v266_v33 = vmul.f32 %v555_v18, %v264_v30 }
  0x59   : > { %267 = vst [vmem:[%s167_s30] sm:$0xff] %v266_v33  ;;  %vm268_vm0 = vcmp.gt.f32.partialorder %v266_v33, 0.5 }
  0x5a   : > { %v269_v36 = vsel %vm268_vm0, 1, %v667_v35 }
  0x5b   : > { %571 = shalt.err (!%p568_p5)
}
  0x5c   : > { %s572_s23 = scalar_lea.hbm %s759_s7, 128  ;;  %s576_s26 = scalar_lea.hbm %s830_s1, 256 }
  0x5d   : > { %p573_p6 = scmp.ne.s32.totalorder %s759_s7, %s572_s23  ;;  %p577_p10 = scmp.lt.s32.totalorder %s759_s7, %s830_s1 }
  0x5e   : > { %p578_p11 = scmp.lt.s32.totalorder %s576_s26, %s572_s23 }
  0x5f   : > { %p574_p7 = pnand %p573_p6, %p725_p4 }
  0x60   : > { %p579_p12 = por %p578_p11, %p577_p10 }
  0x61   : > { %p575_p9 = pneg %p574_p7 }
  0x63   : > { %p580_p13 = pnand %p579_p12, %p575_p9 }
  0x65   : > { %583 = shalt.err (!%p580_p13)
}
  0x66   : > { %492 = dma.vmem_to_hbm [thread:$0]  (%p725_p4), %s754_s3, 128, %s759_s7, %s317_s8   ;;  %v270_v37 = vpack.c.b16 %v269_v36, %v269_v36  ;;  %v279_v39 = vsub.s32 %v276_v34, %v745_v4 }
  0x67   : > { %s471_s30 = sshll.u32 %s750_s28, 1  ;;  %s491_s3 = sshll.u32 %s656_s12, 5 }
  0x68   : > { %v271_v38 = vpack.c.b8 %v270_v37, %v270_v37  ;;  %s174_s4 = scalar_lea.vmem [#allocation4], %s471_s30  ;;  %s352_s8 = scalar_lea.hbm %s831_s2, %s491_s3 }
  0x69   : > { %s354_s5 = sshll.u32 %s174_s4, 4  ;;  %s322_s15 = scalar_lea.sflag [#allocation5], %s750_s28  ;;  %s785_s5 = int_to_ptr.vmem [resolvable:$true] %s354_s5 }
  0x6a   : > { %vm272_vm1 = vnez %v271_v38  ;;  %s584_s16 = scalar_lea.vmem %s785_s5, 32  ;;  %s669_s18 = smov [#allocation4]  }
  0x6b   : > { %v273_v40 = vsel %vm272_vm1, 16843009, %v667_v35  ;;  %p585_p0 = scmp.ne.s32.totalorder %s785_s5, %s584_s16  ;;  %s588_s12 = sshll.u32 %s669_s18, 4  ;;  %s589_s12 = int_to_ptr.vmem [resolvable:$false] %s588_s12 }
  0x6c   : > { %v280_v41 = vrot.slane %v273_v40, %v279_v39  ;;  %s590_s20 = scalar_lea.vmem %s589_s12, 64  ;;  %p591_p3 = scmp.lt.s32.totalorder %s785_s5, %s589_s12 }
  0x6d   : > { %p586_p1 = pnand %p585_p0, %p725_p4  ;;  %p592_p5 = scmp.lt.s32.totalorder %s590_s20, %s584_s16 }
  0x6e   : > { %v281_v42 = vcombine.high %v280_v41, %v280_v41  ;;  %v288_v43 = vrot.slane %v280_v41, %v279_v39 }
  0x6f   : > { %p587_p2 = pneg %p586_p1  ;;  %p593_p6 = por %p592_p5, %p591_p3 }
  0x70   : > { %v295_v44 = vrot.slane %v281_v42, %v279_v39  ;;  %vm296_vm2 = vnez %v288_v43 }
  0x71   : > { %v298_v45 = vsel %vm296_vm2, 16843009, %v667_v35  ;;  %p594_p7 = pnand %p593_p6, %p587_p2 }
  0x72   : > { %vm297_vm3 = vnez %v295_v44 }
  0x73   : > { %v299_v46 = vsel %vm297_vm3, 16843009, %v667_v35 }
  0x74   : > { %v300_v47 = vcombine.low %v298_v45, %v299_v46 }
  0x76   : > { %v307_v48 = vrot.slane %v300_v47, %v279_v39 }
  0x78   : > { %480 = vst.sshfl [vmem:[%s174_s4] sm:$0x5 pattern:$0x73625140] %v307_v48 }
  0x79   : > { %597 = shalt.err (!%p594_p7)
}
  0x7a   : > { %s598_s23 = scalar_lea.hbm %s352_s8, 32  ;;  %s602_s25 = scalar_lea.hbm %s831_s2, 64 }
  0x7b   : > { %p599_p9 = scmp.ne.s32.totalorder %s352_s8, %s598_s23  ;;  %p603_p12 = scmp.lt.s32.totalorder %s352_s8, %s831_s2 }
  0x7c   : > { %p604_p13 = scmp.lt.s32.totalorder %s602_s25, %s598_s23 }
  0x7d   : > { %p600_p10 = pnand %p599_p9, %p725_p4 }
  0x7e   : > { %p605_p0 = por %p604_p13, %p603_p12 }
  0x7f   : > { %p601_p11 = pneg %p600_p10 }
  0x81   : > { %p606_p1 = pnand %p605_p0, %p601_p11 }
  0x83   : > { %609 = shalt.err (!%p606_p1)
}
  0x84   : > { %493 = dma.vmem_to_hbm [thread:$0]  (%p725_p4), %s785_s5, 32, %s352_s8, %s322_s15  }
  0x85 PF: > { %p503_p2 = scmp.ge.s32.totalorder %s664_s14, 2  ;;  %s366_s29 = sand.u32 1, %s644_s9  }
  0x86   : > { %s367_s30 = scalar_lea.sflag [#allocation3], %s366_s29 }
  0x87   : > { %p497_p3 = pnand %p503_p2, %p732_p8 }
  0x89   : > { %p498_p5 = pneg %p497_p3 }
  0x8b   : > { %635 = dma.done.wait (%p498_p5), %s367_s30, 128  }
  0x8c   : > { %637 = vsyncadd (%p498_p5), %s367_s30, 4294967168  ;;  %s376_s4 = scalar_lea.sflag [#allocation5], %s366_s29 }
  0x8d   : > { %639 = dma.done.wait (%p498_p5), %s376_s4, 32  }
  0x8e   : > { %641 = vsyncadd (%p498_p5), %s376_s4, 4294967264  ;;  %s19_s14 = sadd.s32 1, %s664_s14   ;;  %s834_s9 = smov %s648_s10 }
  0x8f   : > { %p16_p6 = scmp.ge.s32.totalorder %s19_s14, 4   ;;  %s835_s10 = smov %s652_s11 }
  0x90   : > { %s836_s11 = smov %s738_s22  ;;  %s837_s12 = smov %s660_s13 }
  0x91   : > { %s838_s13 = smov %s840_s17  ;;  %18 = sbr.rel (!%p16_p6) target bundleno = 6 (0x6), region = 76 }
  0x96   :  { %381 = vsyncpa [#allocation3], 1 }
  0x97   :  { %383 = vsyncpa [#allocation3 + $0x1], 1 }
  0x98   :  { %384 = vsyncpa [#allocation5], 1 }
  0x99   :  { %386 = vsyncpa [#allocation5 + $0x1], 1 }

</bundles_post_ra>
